<compile_context>
chip_gen: v7x
topology: tpu7x:2x2x1
jax: 0.10.0
libtpu: 0.0.40
codegen_flags: <defaults>
</compile_context>

<pallas_src>
import functools

import jax
import jax.numpy as jnp
from jax import lax
from jax.experimental import pallas as pl
from jax.experimental.pallas import tpu as pltpu


def _nnue_kernel(x_ref, w1_ref, b1_ref, w2_ref, b2_ref, w3t_ref, b3_ref, o_ref):
    # Layer 1: Linear + ClippedReLU. bf16 operands on the MXU, f32 accumulate.
    h1 = jnp.dot(x_ref[...], w1_ref[...], preferred_element_type=jnp.float32)
    h1 = jnp.clip(h1 + b1_ref[...], 0.0, 1.0)

    # Layer 2: Linear + ClippedReLU.
    h2 = jnp.dot(h1.astype(jnp.bfloat16), w2_ref[...],
                 preferred_element_type=jnp.float32)
    h2 = jnp.clip(h2 + b2_ref[...], 0.0, 1.0)

    # Layer 3: Linear + Scale(512), emitted lane-dense as [out_count, tb]:
    #   out[o, b] = sum_k w3t[o, k] * h2[b, k]
    out = lax.dot_general(
        w3t_ref[...], h2.astype(jnp.bfloat16),
        dimension_numbers=(((1,), (1,)), ((), ())),
        preferred_element_type=jnp.float32,
    )
    o_ref[...] = ((out + b3_ref[...]) * 512.0).astype(o_ref.dtype)


def nnue_forward(x, w1, b1, w2, b2, w3, b3, *, tb=256):
    """x: [B, input_count] float32. Weights stored [in, out], biases [out].

    Returns [B, output_count] float32.
    """
    B, in_count = x.shape
    l1 = w1.shape[1]
    l2 = w2.shape[1]
    out_count = w3.shape[1]

    # Lane-dense output block ([out_count, tb]) wants tb % 128 == 0.
    tb = max(128, (tb // 128) * 128)
    # Pad the batch up to a tile multiple (padded rows are discarded at the end).
    b_pad = pl.cdiv(B, tb) * tb
    if b_pad != B:
        x = jnp.pad(x, ((0, b_pad - B), (0, 0)))

    # bf16 MXU feeds (halves HBM/VMEM traffic for x and the weights).
    x_bf = x.astype(jnp.bfloat16)
    w1_bf = w1.astype(jnp.bfloat16)
    w2_bf = w2.astype(jnp.bfloat16)
    w3t_bf = w3.T.astype(jnp.bfloat16)                       # [out_count, l2]

    # Biases stay f32; shaped to broadcast against the f32 accumulators.
    b1_2d = b1.reshape(1, l1).astype(jnp.float32)
    b2_2d = b2.reshape(1, l2).astype(jnp.float32)
    b3_2d = b3.reshape(out_count, 1).astype(jnp.float32)     # [out_count, 1]

    grid = (b_pad // tb,)

    out_t = pl.pallas_call(
        _nnue_kernel,
        out_shape=jax.ShapeDtypeStruct((out_count, b_pad), jnp.float32),
        grid_spec=pltpu.PrefetchScalarGridSpec(
            num_scalar_prefetch=0,
            grid=grid,
            in_specs=[
                pl.BlockSpec((tb, in_count), lambda i: (i, 0)),   # x tile (bf16)
                pl.BlockSpec((in_count, l1), lambda i: (0, 0)),   # W1 (full)
                pl.BlockSpec((1, l1), lambda i: (0, 0)),          # b1
                pl.BlockSpec((l1, l2), lambda i: (0, 0)),         # W2 (full)
                pl.BlockSpec((1, l2), lambda i: (0, 0)),          # b2
                pl.BlockSpec((out_count, l2), lambda i: (0, 0)),  # W3ᵀ (full)
                pl.BlockSpec((out_count, 1), lambda i: (0, 0)),   # b3 (column)
            ],
            # Lane-dense output slab: [out_count, b_pad], tiled along the lane axis.
            out_specs=pl.BlockSpec((out_count, tb), lambda i: (0, i)),
        ),
        compiler_params=pltpu.CompilerParams(
            # Batch axis is independent -> shard grid steps across TCs (v7x megacore).
            dimension_semantics=("parallel",),
        ),
    )(x_bf, w1_bf, b1_2d, w2_bf, b2_2d, w3t_bf, b3_2d)

    # Transpose back to the torch-style [B, out_count] layout and drop padding.
    return out_t.T[:B]


def init_params(key, input_count, l1_count, l2_count, output_count):
    """Kaiming-normal (fan_in, relu gain) weights, zero biases — matching
    torch.nn.init.kaiming_normal_(w, nonlinearity='relu') + zeros_(bias)."""
    k1, k2, k3 = jax.random.split(key, 3)

    def kaiming(k, fan_in, fan_out):
        std = jnp.sqrt(2.0 / fan_in)
        # stored as [in, out] for direct row-major matmul in the kernel
        return jax.random.normal(k, (fan_in, fan_out), dtype=jnp.float32) * std

    w1 = kaiming(k1, input_count, l1_count)
    b1 = jnp.zeros((l1_count,), dtype=jnp.float32)
    w2 = kaiming(k2, l1_count, l2_count)
    b2 = jnp.zeros((l2_count,), dtype=jnp.float32)
    w3 = kaiming(k3, l2_count, output_count)
    b3 = jnp.zeros((output_count,), dtype=jnp.float32)
    return w1, b1, w2, b2, w3, b3


def reference_forward(x, w1, b1, w2, b2, w3, b3):
    h1 = jnp.clip(x @ w1 + b1.reshape(1, -1), 0.0, 1.0)
    h2 = jnp.clip(h1 @ w2 + b2.reshape(1, -1), 0.0, 1.0)
    return (h2 @ w3 + b3.reshape(1, -1)) * 512.0


if __name__ == "__main__":
    # NNUE-like sizes: input_count=64, l1=32, l2=32, output=1.
    # batch=512 with tb=256 -> grid of 2 parallel steps (both v7x cores get work).
    input_count, l1_count, l2_count, output_count = 64, 32, 32, 1
    batch, tb = 512, 256

    key = jax.random.PRNGKey(0)
    kx, kp = jax.random.split(key)

    x = jax.random.uniform(kx, (batch, input_count), dtype=jnp.float32)
    params = init_params(kp, input_count, l1_count, l2_count, output_count)

    fwd = jax.jit(functools.partial(nnue_forward, tb=tb))
    y = fwd(x, *params)
    y = jax.block_until_ready(y)

    # Sanity check vs. pure-JAX f32 reference (loose tolerance: kernel uses bf16
    # MXU operands with f32 accumulation, and the 512x scale amplifies abs error).
    y_ref = reference_forward(x, *params)
    assert y.shape == (batch, output_count)
    assert jnp.allclose(y, y_ref, atol=4.0, rtol=0.1), (
        "mismatch vs reference; max abs err = "
        f"{float(jnp.max(jnp.abs(y - y_ref)))}"
    )

    print("KERNEL_OK")
</pallas_src>

<mosaic_0001>
module attributes {stable_mosaic.version = 11 : i64} {
  func.func @_nnue_kernel(%arg0: i32, %arg1: memref<256x64xbf16, #tpu.memory_space<vmem>>, %arg2: memref<64x32xbf16, #tpu.memory_space<vmem>>, %arg3: memref<1x32xf32, #tpu.memory_space<vmem>>, %arg4: memref<32x32xbf16, #tpu.memory_space<vmem>>, %arg5: memref<1x32xf32, #tpu.memory_space<vmem>>, %arg6: memref<1x32xbf16, #tpu.memory_space<vmem>>, %arg7: memref<1x1xf32, #tpu.memory_space<vmem>>, %arg8: memref<1x256xf32, #tpu.memory_space<vmem>>) attributes {dimension_semantics = [#tpu.dimension_semantics<parallel>], iteration_bounds = array<i64: 2>, scalar_prefetch = 0 : i64, scratch_operands = 0 : i64, tpu.core_type = #tpu.core_type<tc>, window_params = [{transform_indices = @transform_0, window_bounds = array<i64: 256, 64>}, {pipeline_mode = #tpu.pipeline_mode<synchronous>, transform_indices = @transform_1, window_bounds = array<i64: 64, 32>}, {pipeline_mode = #tpu.pipeline_mode<synchronous>, transform_indices = @transform_2, window_bounds = array<i64: 1, 32>}, {pipeline_mode = #tpu.pipeline_mode<synchronous>, transform_indices = @transform_3, window_bounds = array<i64: 32, 32>}, {pipeline_mode = #tpu.pipeline_mode<synchronous>, transform_indices = @transform_4, window_bounds = array<i64: 1, 32>}, {pipeline_mode = #tpu.pipeline_mode<synchronous>, transform_indices = @transform_5, window_bounds = array<i64: 1, 32>}, {pipeline_mode = #tpu.pipeline_mode<synchronous>, transform_indices = @transform_6, window_bounds = array<i64: 1, 1>}, {transform_indices = @transform_7, window_bounds = array<i64: 1, 256>}]} {
    %c0 = arith.constant 0 : index
    %c0_0 = arith.constant 0 : index
    %0 = vector.load %arg1[%c0, %c0_0] : memref<256x64xbf16, #tpu.memory_space<vmem>>, vector<256x64xbf16>
    %c0_1 = arith.constant 0 : index
    %c0_2 = arith.constant 0 : index
    %1 = vector.load %arg2[%c0_1, %c0_2] : memref<64x32xbf16, #tpu.memory_space<vmem>>, vector<64x32xbf16>
    %cst = arith.constant dense<0.000000e+00> : vector<256x32xf32>
    %2 = tpu.matmul %0, %1, %cst {dimension_numbers = #tpu.dot_dimension_numbers<[1], [0], [0], [1], [0, 0, 1, 1], [], []>} : vector<256x64xbf16>, vector<64x32xbf16>, vector<256x32xf32> -> vector<256x32xf32>
    %c0_3 = arith.constant 0 : index
    %c0_4 = arith.constant 0 : index
    %3 = vector.load %arg3[%c0_3, %c0_4] : memref<1x32xf32, #tpu.memory_space<vmem>>, vector<1x32xf32>
    %4 = vector.broadcast %3 : vector<1x32xf32> to vector<256x32xf32>
    %5 = arith.addf %2, %4 : vector<256x32xf32>
    %cst_5 = arith.constant 0.000000e+00 : f32
    %cst_6 = arith.constant 1.000000e+00 : f32
    %6 = vector.broadcast %cst_5 : f32 to vector<256x32xf32>
    %7 = arith.maximumf %6, %5 : vector<256x32xf32>
    %8 = vector.broadcast %cst_6 : f32 to vector<256x32xf32>
    %9 = arith.minimumf %8, %7 : vector<256x32xf32>
    %10 = arith.truncf %9 : vector<256x32xf32> to vector<256x32xbf16>
    %c0_7 = arith.constant 0 : index
    %c0_8 = arith.constant 0 : index
    %11 = vector.load %arg4[%c0_7, %c0_8] : memref<32x32xbf16, #tpu.memory_space<vmem>>, vector<32x32xbf16>
    %cst_9 = arith.constant dense<0.000000e+00> : vector<256x32xf32>
    %12 = tpu.matmul %10, %11, %cst_9 {dimension_numbers = #tpu.dot_dimension_numbers<[1], [0], [0], [1], [0, 0, 1, 1], [], []>} : vector<256x32xbf16>, vector<32x32xbf16>, vector<256x32xf32> -> vector<256x32xf32>
    %c0_10 = arith.constant 0 : index
    %c0_11 = arith.constant 0 : index
    %13 = vector.load %arg5[%c0_10, %c0_11] : memref<1x32xf32, #tpu.memory_space<vmem>>, vector<1x32xf32>
    %14 = vector.broadcast %13 : vector<1x32xf32> to vector<256x32xf32>
    %15 = arith.addf %12, %14 : vector<256x32xf32>
    %cst_12 = arith.constant 0.000000e+00 : f32
    %cst_13 = arith.constant 1.000000e+00 : f32
    %16 = vector.broadcast %cst_12 : f32 to vector<256x32xf32>
    %17 = arith.maximumf %16, %15 : vector<256x32xf32>
    %18 = vector.broadcast %cst_13 : f32 to vector<256x32xf32>
    %19 = arith.minimumf %18, %17 : vector<256x32xf32>
    %c0_14 = arith.constant 0 : index
    %c0_15 = arith.constant 0 : index
    %20 = vector.load %arg6[%c0_14, %c0_15] : memref<1x32xbf16, #tpu.memory_space<vmem>>, vector<1x32xbf16>
    %21 = arith.truncf %19 : vector<256x32xf32> to vector<256x32xbf16>
    %cst_16 = arith.constant dense<0.000000e+00> : vector<1x256xf32>
    %22 = tpu.matmul %20, %21, %cst_16 {dimension_numbers = #tpu.dot_dimension_numbers<[1], [1], [0], [0], [0, 0, 1, 0], [], []>} : vector<1x32xbf16>, vector<256x32xbf16>, vector<1x256xf32> -> vector<1x256xf32>
    %c0_17 = arith.constant 0 : index
    %c0_18 = arith.constant 0 : index
    %23 = vector.load %arg7[%c0_17, %c0_18] : memref<1x1xf32, #tpu.memory_space<vmem>>, vector<1x1xf32>
    %24 = vector.broadcast %23 : vector<1x1xf32> to vector<1x256xf32>
    %25 = arith.addf %22, %24 : vector<1x256xf32>
    %cst_19 = arith.constant 5.120000e+02 : f32
    %26 = vector.broadcast %cst_19 : f32 to vector<1x256xf32>
    %27 = arith.mulf %25, %26 : vector<1x256xf32>
    %c0_20 = arith.constant 0 : index
    %c0_21 = arith.constant 0 : index
    %28 = vector.load %arg8[%c0_20, %c0_21] : memref<1x256xf32, #tpu.memory_space<vmem>>, vector<1x256xf32>
    tpu.vector_store %arg8[%c0_20, %c0_21], %27 {strides = array<i32>} : memref<1x256xf32, #tpu.memory_space<vmem>>, vector<1x256xf32>,
    return
  }
  func.func @transform_0(%arg0: i32) -> (i32, i32) {
    %c0_i32 = arith.constant 0 : i32
    %c0_i32_0 = arith.constant 0 : i32
    return %arg0, %c0_i32 : i32, i32
  }
  func.func @transform_1(%arg0: i32) -> (i32, i32) {
    %c0_i32 = arith.constant 0 : i32
    %c0_i32_0 = arith.constant 0 : i32
    %c0_i32_1 = arith.constant 0 : i32
    return %c0_i32, %c0_i32_0 : i32, i32
  }
  func.func @transform_2(%arg0: i32) -> (i32, i32) {
    %c0_i32 = arith.constant 0 : i32
    %c0_i32_0 = arith.constant 0 : i32
    %c0_i32_1 = arith.constant 0 : i32
    return %c0_i32, %c0_i32_0 : i32, i32
  }
  func.func @transform_3(%arg0: i32) -> (i32, i32) {
    %c0_i32 = arith.constant 0 : i32
    %c0_i32_0 = arith.constant 0 : i32
    %c0_i32_1 = arith.constant 0 : i32
    return %c0_i32, %c0_i32_0 : i32, i32
  }
  func.func @transform_4(%arg0: i32) -> (i32, i32) {
    %c0_i32 = arith.constant 0 : i32
    %c0_i32_0 = arith.constant 0 : i32
    %c0_i32_1 = arith.constant 0 : i32
    return %c0_i32, %c0_i32_0 : i32, i32
  }
  func.func @transform_5(%arg0: i32) -> (i32, i32) {
    %c0_i32 = arith.constant 0 : i32
    %c0_i32_0 = arith.constant 0 : i32
    %c0_i32_1 = arith.constant 0 : i32
    return %c0_i32, %c0_i32_0 : i32, i32
  }
  func.func @transform_6(%arg0: i32) -> (i32, i32) {
    %c0_i32 = arith.constant 0 : i32
    %c0_i32_0 = arith.constant 0 : i32
    %c0_i32_1 = arith.constant 0 : i32
    return %c0_i32, %c0_i32_0 : i32, i32
  }
  func.func @transform_7(%arg0: i32) -> (i32, i32) {
    %c0_i32 = arith.constant 0 : i32
    %c0_i32_0 = arith.constant 0 : i32
    return %c0_i32, %arg0 : i32, i32
  }
}

</mosaic_0001>

<bundles_post_ra>
// kernel: nnue_forward.1
= control target key start
LH: loop header
LB: loop body
LE: loop exit
PB: predicated region body
PF: predicated region fallthrough
CT: control target
= control target key end

     0   :  { %s1961_s0 = inlined_call_operand.vmem [shape: bf16[512,64], index: 0, kind: input, shape index: {}]   ;;  %s1962_s1 = inlined_call_operand.vmem [shape: bf16[64,32], index: 1, kind: input, shape index: {}]   ;;  %s1963_s2 = inlined_call_operand.vmem [shape: f32[1,32], index: 2, kind: input, shape index: {}]   ;;  %s1964_s3 = inlined_call_operand.vmem [shape: bf16[32,32], index: 3, kind: input, shape index: {}]   ;;  %s1965_s4 = inlined_call_operand.vmem [shape: f32[1,32], index: 4, kind: input, shape index: {}]   ;;  %s1966_s5 = inlined_call_operand.vmem [shape: bf16[1,32], index: 5, kind: input, shape index: {}]   ;;  %s1967_s6 = inlined_call_operand.<no memory space> [shape: f32[1,1], index: 6, kind: input, shape index: {}]   ;;  %s1968_s7 = inlined_call_operand.hbm [shape: f32[1,512], index: 7, kind: output, shape index: {}]  }
   0x1   :  { %v12_v0 = vstv %s1967_s6 }
   0x2   :  { %13 = vst [vmem:[#allocation2] sm:$0x1] %v12_v0 }
   0x3   :  { %14 = vsyncpa [#allocation4], 0 }
   0x4   :  { %16 = vsyncpa [#allocation4 + $0x1], 0  ;;  %s1623_s26 = smov 0   ;;  %s1625_s27 = smov 0  }
   0x5   :  { %s1627_s28 = smov 0   ;;  %s1629_s29 = smov 0  }
   0x6 LB: > { %s1238_s6 = sadd.s32 4294967295, %s1575_s29   ;;  %s1239_s30 = sadd.s32 4294967294, %s1575_s29   ;;  %s1575_s29 = sphi %s1629_s29, %s1974_s29   ;;  %s1571_s28 = sphi %s1627_s28, %s1973_s28   ;;  %s1567_s27 = sphi %s1625_s27, %s1972_s27   ;;  %s1563_s26 = sphi %s1623_s26, %s1971_s26  }
   0x7   : > { %s1646_s8 = sadd.s32 1, %s1575_s29   ;;  %s181_s9 = sadd.s32 1, %s1571_s28 }
   0x8   : > { %s178_s10 = ssub.s32 %s1575_s29, %s1646_s8  ;;  %p191_p0 = scmp.ne.s32.totalorder %s1571_s28, %s1567_s27 }
   0x9   : > { %p179_p1 = scmp.eq.s32.totalorder %s178_s10, 0  ;;  %p192_p2 = scmp.eq.s32.totalorder %s1238_s6, 1 }
   0xa   : > { %p197_p3 = scmp.ne.s32.totalorder %s1567_s27, %s1563_s26  ;;  %p198_p4 = scmp.eq.s32.totalorder %s1239_s30, 1 }
   0xb   : > { %s1656_s11 = scalar_select %p179_p1, %s1571_s28, %s181_s9  }
   0xc   : > { %p1658_p5 = por %p192_p2, %p191_p0  ;;  %p1662_p6 = por %p198_p4, %p197_p3 }
   0xd   : > { %p1242_p7 = scmp.ge.s32.totalorder %s1575_s29, 1  ;;  %p243_p8 = scmp.lt.s32.totalorder %s1575_s29, 3 }
   0xf   : > { %p244_p9 = pnand %p1242_p7, %p243_p8 }
  0x10   : > { %v1491_v1 = vld [vmem:[%s1962_s1] sm:$0xff] (!%p244_p9)   ;;  %s1671_s16 = sshll.u32 (!%p244_p9), %s1238_s6, 5  ;;  %v1492_v2 = vld [vmem:[%s1962_s1 + $0x8] sm:$0xff] (!%p244_p9)   ;;  %v1493_v3 = vld [vmem:[%s1962_s1 + $0x10] sm:$0xff] (!%p244_p9)   ;;  %vm434_vm0 = vcmask (!%p244_p9), 523264   ;;  %vm747_vm1 = vcmask (!%p244_p9), 261120  }
  0x11   : > { %247 = sbr.rel (%p244_p9) target bundleno = 813 (0x32d), region = 48  ;;  %p276_p10 = scmp.lt.s32.totalorder (!%p244_p9), %s1671_s16, 63  ;;  %1365 = vmatprep.subr.bf16.mxu0 (!%p244_p9), %v1491_v1  ;;  %v1494_v5 = vld [vmem:[%s1962_s1 + $0x18] sm:$0xff] (!%p244_p9)   ;;  %v1511_v21 = vld [vmem:[%s1964_s3] sm:$0xff] (!%p244_p9)   ;;  %v1512_v22 = vld [vmem:[%s1964_s3 + $0x8] sm:$0xff] (!%p244_p9)  }
  0x12   : > { %1366 = vmatpush3.bf16.msra.mxu0 (!%p244_p9), %v1491_v1  ;;  %1405 = vmatprep.subr.bf16.mxu1 (!%p244_p9), %v1511_v21  ;;  %v1730_v23 = vld [vmem:[%s1963_s2] ss:$0 sm:$0xff] (!%p244_p9)  ;;  %s272_s23 = sand.u32 (!%p244_p9), 1, %s1567_s27   ;;  %s1919_s10 = scalar_lea.hbm (!%p244_p9), %s1968_s7, %s1671_s16 }
  0x13   : > { %1367 = vmatprep.subr.bf16.mxu0 (!%p244_p9), %v1492_v2  ;;  %1406 = vmatpush3.bf16.msra.mxu1 (!%p244_p9), %v1511_v21  ;;  %s1243_s24 = sshll.u32 (!%p244_p9), %s272_s23, 1  ;;  %s1166_s14 = scalar_lea.sflag (!%p244_p9), [#allocation4], %s272_s23 }
  0x14   : > { %1407 = vmatprep.subr.bf16.mxu1 (!%p244_p9), %v1512_v22  ;;  %s1579_s17 = smov (!%p244_p9), [#allocation3]  }
  0x15   : > { %s1517_s18 = sshll.u32 (!%p244_p9), %s1579_s17, 4  ;;  %s1518_s18 = int_to_ptr.vmem [resolvable:$false] %s1517_s18 }
  0x16   : > { %1368 = vmatpush3.bf16.msra.mxu0 (!%p244_p9), %v1492_v2  ;;  %s1519_s19 = scalar_lea.vmem (!%p244_p9), %s1518_s18, 64 }
  0x17   : > { %1369 = vmatprep.subr.bf16.mxu0 (!%p244_p9), %v1493_v3  ;;  %1408 = vmatpush3.bf16.msra.mxu1 (!%p244_p9), %v1512_v22 }
  0x18   : > { %s277_s21 = scalar_select %p276_p10, %s1671_s16, 63 }
  0x1a   : > { %s1245_s22 = sshll.u32 %s277_s21, 2  ;;  %1370 = vmatpush3.bf16.msra.mxu0 %v1493_v3 }
  0x1b   : > { %s1684_s25 = scalar_lea.vmem %s1961_s0, %s1245_s22  ;;  %1371 = vmatprep.subr.bf16.mxu0 %v1494_v5 }
  0x1c   : > { %v1495_v4 = vld [vmem:[%s1684_s25] sm:$0xff]   ;;  %v1496_v6 = vld [vmem:[%s1684_s25 + $0x8] sm:$0xff]   ;;  %v1497_v7 = vld [vmem:[%s1684_s25 + $0x10] sm:$0xff]  }
  0x1d   : > { %1373 = vmatprep.mubr.msk.bf16.mxu0 %vm434_vm0, %v1495_v4  ;;  %v1498_v8 = vld [vmem:[%s1684_s25 + $0x18] sm:$0xff]   ;;  %v1499_v9 = vld [vmem:[%s1684_s25 + $0x20] sm:$0xff]   ;;  %v1500_v10 = vld [vmem:[%s1684_s25 + $0x28] sm:$0xff]  }
  0x1e   : > { %1372 = vmatpush3.bf16.msra.mxu0 %v1494_v5  ;;  %v1501_v11 = vld [vmem:[%s1684_s25 + $0x30] sm:$0xff]   ;;  %v1502_v12 = vld [vmem:[%s1684_s25 + $0x38] sm:$0xff]   ;;  %v1503_v13 = vld [vmem:[%s1684_s25 + $0x40] sm:$0xff]  }
  0x1f   : > { %v1504_v14 = vld [vmem:[%s1684_s25 + $0x48] sm:$0xff]   ;;  %v1505_v15 = vld [vmem:[%s1684_s25 + $0x50] sm:$0xff]   ;;  %v1506_v16 = vld [vmem:[%s1684_s25 + $0x58] sm:$0xff]  }
  0x20   : > { %v1507_v17 = vld [vmem:[%s1684_s25 + $0x60] sm:$0xff]   ;;  %v1508_v18 = vld [vmem:[%s1684_s25 + $0x68] sm:$0xff]   ;;  %v1509_v19 = vld [vmem:[%s1684_s25 + $0x70] sm:$0xff]  }
  0x21   : > { %1374 = vmatmul.mubr.msk.bf16.vlgmr.msra.gmra.mrb[0].mxu0 %vm434_vm0, %v1496_v6  ;;  %v1510_v20 = vld [vmem:[%s1684_s25 + $0x78] sm:$0xff]   ;;  %s274_s25 = scalar_lea.vmem [#allocation3], %s1243_s24 }
  0x22   : > { %1377 = vmatprep.mubr.msk.bf16.mxu0 %vm434_vm0, %v1497_v7  ;;  %s1180_s6 = sshll.u32 %s274_s25, 4  ;;  %s1921_s6 = int_to_ptr.vmem [resolvable:$true] %s1180_s6 }
  0x23   : > { %s1513_s15 = scalar_lea.vmem %s1921_s6, 32  ;;  %p1520_p0 = scmp.lt.s32.totalorder %s1921_s6, %s1518_s18 }
  0x24   : > { %p1514_p11 = scmp.ne.s32.totalorder %s1921_s6, %s1513_s15  ;;  %p1521_p1 = scmp.lt.s32.totalorder %s1519_s19, %s1513_s15 }
  0x26   : > { %p1515_p12 = pnand %p1514_p11, %p1658_p5  ;;  %p1522_p2 = por %p1521_p1, %p1520_p0 }
  0x28   : > { %p1516_p13 = pneg %p1515_p12 }
  0x29   : > { %1378 = vmatmul.mubr.msk.bf16.gmra.mrb[4].mxu0 %vm434_vm0, %v1498_v8 }
  0x2a   : > { %1381 = vmatprep.mubr.msk.bf16.mxu0 %vm434_vm0, %v1499_v9  ;;  %p1523_p3 = pnand %p1522_p2, %p1516_p13 }
  0x31   : > { %1382 = vmatmul.mubr.msk.bf16.gmra.mrb[8].mxu0 %vm434_vm0, %v1500_v10 }
  0x32   : > { %1385 = vmatprep.mubr.msk.bf16.mxu0 %vm434_vm0, %v1501_v11 }
  0x39   : > { %1386 = vmatmul.mubr.msk.bf16.gmra.mrb[12].mxu0 %vm434_vm0, %v1502_v12 }
  0x3a   : > { %1389 = vmatprep.mubr.msk.bf16.mxu0 %vm434_vm0, %v1503_v13 }
  0x41   : > { %1390 = vmatmul.mubr.msk.bf16.gmra.mrb[16].mxu0 %vm434_vm0, %v1504_v14 }
  0x42   : > { %1393 = vmatprep.mubr.msk.bf16.mxu0 %vm434_vm0, %v1505_v15 }
  0x49   : > { %1394 = vmatmul.mubr.msk.bf16.gmra.mrb[20].mxu0 %vm434_vm0, %v1506_v16 }
  0x4a   : > { %1397 = vmatprep.mubr.msk.bf16.mxu0 %vm434_vm0, %v1507_v17 }
  0x51   : > { %1398 = vmatmul.mubr.msk.bf16.gmra.mrb[24].mxu0 %vm434_vm0, %v1508_v18 }
  0x52   : > { %1401 = vmatprep.mubr.msk.bf16.mxu0 %vm434_vm0, %v1509_v19 }
  0x59   : > { %1402 = vmatmul.mubr.msk.bf16.gmra.mrb[28].mxu0 %vm434_vm0, %v1510_v20 }
  0xf4   : > { %v1375_v24 = vpop.f32.mrb[0].mxu0 }
  0xf5   : > { %v526_v25 = vadd.f32 %v1375_v24, %v1730_v23  ;;  %v517_v26 = vpop.f32.mrb[1].mxu0 }
  0xf6   : > { %v518_v27 = vadd.f32 %v1730_v23, %v517_v26  ;;  %v1376_v28 = vpop.f32.mrb[2].mxu0 }
  0xf7   : > { %v646_v29 = vmax.f32 %v526_v25, 0.0  ;;  %v529_v30 = vadd.f32 %v1376_v28, %v1730_v23  ;;  %v520_v31 = vpop.f32.mrb[3].mxu0 }
  0xf8   : > { %v644_v32 = vmax.f32 %v518_v27, 0.0  ;;  %v521_v33 = vadd.f32 %v1730_v23, %v520_v31 }
  0xf9   : > { %v647_v34 = vmax.f32 %v529_v30, 0.0  ;;  %v678_v36 = vmin.f32 %v646_v29, 1.0 }
  0xfa   : > { %v645_v35 = vmax.f32 %v521_v33, 0.0  ;;  %v676_v38 = vmin.f32 %v644_v32, 1.0 }
  0xfb   : > { %v679_v37 = vmin.f32 %v647_v34, 1.0 }
  0xfc   : > { %v677_v39 = vmin.f32 %v645_v35, 1.0  ;;  %v1379_v40 = vpop.f32.mrb[4].mxu0 }
  0xfd   : > { %v709_v41 = vpack.c.bf16 %v679_v37, %v678_v36  ;;  %v542_v42 = vadd.f32 %v1379_v40, %v1730_v23  ;;  %v533_v43 = vpop.f32.mrb[5].mxu0 }
  0xfe   : > { %v534_v44 = vadd.f32 %v1730_v23, %v533_v43  ;;  %v1380_v45 = vpop.f32.mrb[6].mxu0  ;;  %v708_v46 = vpack.c.bf16 %v677_v39, %v676_v38 }
  0xff   : > { %v650_v47 = vmax.f32 %v542_v42, 0.0  ;;  %v545_v48 = vadd.f32 %v1380_v45, %v1730_v23  ;;  %v536_v49 = vpop.f32.mrb[7].mxu0 }
 0x100   : > { %v648_v50 = vmax.f32 %v534_v44, 0.0  ;;  %v537_v51 = vadd.f32 %v1730_v23, %v536_v49  ;;  %1409 = vmatprep.mubr.msk.bf16.mxu1 %vm747_vm1, %v708_v46 }
 0x101   : > { %v651_v52 = vmax.f32 %v545_v48, 0.0  ;;  %1410 = vmatmul.mubr.msk.bf16.vlgmr.msra.gmra.mrb[0].mxu1 %vm747_vm1, %v709_v41  ;;  %v682_v54 = vmin.f32 %v650_v47, 1.0 }
 0x102   : > { %v649_v53 = vmax.f32 %v537_v51, 0.0  ;;  %v680_v56 = vmin.f32 %v648_v50, 1.0 }
 0x103   : > { %v683_v55 = vmin.f32 %v651_v52, 1.0 }
 0x104   : > { %v681_v57 = vmin.f32 %v649_v53, 1.0  ;;  %v1383_v58 = vpop.f32.mrb[8].mxu0 }
 0x105   : > { %v711_v59 = vpack.c.bf16 %v683_v55, %v682_v54  ;;  %v558_v60 = vadd.f32 %v1383_v58, %v1730_v23  ;;  %v549_v61 = vpop.f32.mrb[9].mxu0 }
 0x106   : > { %v710_v62 = vpack.c.bf16 %v681_v57, %v680_v56  ;;  %v550_v63 = vadd.f32 %v1730_v23, %v549_v61  ;;  %v1384_v0 = vpop.f32.mrb[10].mxu0 }
 0x107   : > { %v654_v1 = vmax.f32 %v558_v60, 0.0  ;;  %v561_v2 = vadd.f32 %v1384_v0, %v1730_v23  ;;  %v552_v3 = vpop.f32.mrb[11].mxu0 }
 0x108   : > { %v652_v4 = vmax.f32 %v550_v63, 0.0  ;;  %v553_v5 = vadd.f32 %v1730_v23, %v552_v3  ;;  %1413 = vmatprep.mubr.msk.bf16.mxu1 %vm747_vm1, %v710_v62 }
 0x109   : > { %v655_v6 = vmax.f32 %v561_v2, 0.0  ;;  %1414 = vmatmul.mubr.msk.bf16.gmra.mrb[4].mxu1 %vm747_vm1, %v711_v59  ;;  %v686_v8 = vmin.f32 %v654_v1, 1.0 }
 0x10a   : > { %v653_v7 = vmax.f32 %v553_v5, 0.0  ;;  %v684_v10 = vmin.f32 %v652_v4, 1.0 }
 0x10b   : > { %v687_v9 = vmin.f32 %v655_v6, 1.0 }
 0x10c   : > { %v685_v11 = vmin.f32 %v653_v7, 1.0  ;;  %v1387_v12 = vpop.f32.mrb[12].mxu0 }
 0x10d   : > { %v713_v13 = vpack.c.bf16 %v687_v9, %v686_v8  ;;  %v574_v14 = vadd.f32 %v1387_v12, %v1730_v23  ;;  %v565_v15 = vpop.f32.mrb[13].mxu0 }
 0x10e   : > { %v712_v16 = vpack.c.bf16 %v685_v11, %v684_v10  ;;  %v566_v17 = vadd.f32 %v1730_v23, %v565_v15  ;;  %v1388_v18 = vpop.f32.mrb[14].mxu0 }
 0x10f   : > { %v658_v19 = vmax.f32 %v574_v14, 0.0  ;;  %v577_v20 = vadd.f32 %v1388_v18, %v1730_v23  ;;  %v568_v21 = vpop.f32.mrb[15].mxu0 }
 0x110   : > { %v656_v22 = vmax.f32 %v566_v17, 0.0  ;;  %v569_v24 = vadd.f32 %v1730_v23, %v568_v21  ;;  %1417 = vmatprep.mubr.msk.bf16.mxu1 %vm747_vm1, %v712_v16 }
 0x111   : > { %v659_v25 = vmax.f32 %v577_v20, 0.0  ;;  %1418 = vmatmul.mubr.msk.bf16.gmra.mrb[8].mxu1 %vm747_vm1, %v713_v13  ;;  %v690_v27 = vmin.f32 %v658_v19, 1.0 }
 0x112   : > { %v657_v26 = vmax.f32 %v569_v24, 0.0  ;;  %v688_v29 = vmin.f32 %v656_v22, 1.0 }
 0x113   : > { %v691_v28 = vmin.f32 %v659_v25, 1.0 }
 0x114   : > { %v689_v30 = vmin.f32 %v657_v26, 1.0  ;;  %v1391_v31 = vpop.f32.mrb[16].mxu0 }
 0x115   : > { %v715_v32 = vpack.c.bf16 %v691_v28, %v690_v27  ;;  %v590_v33 = vadd.f32 %v1391_v31, %v1730_v23  ;;  %v581_v34 = vpop.f32.mrb[17].mxu0 }
 0x116   : > { %v714_v35 = vpack.c.bf16 %v689_v30, %v688_v29  ;;  %v582_v36 = vadd.f32 %v1730_v23, %v581_v34  ;;  %v1392_v37 = vpop.f32.mrb[18].mxu0 }
 0x117   : > { %v662_v38 = vmax.f32 %v590_v33, 0.0  ;;  %v593_v39 = vadd.f32 %v1392_v37, %v1730_v23  ;;  %v584_v40 = vpop.f32.mrb[19].mxu0 }
 0x118   : > { %v660_v41 = vmax.f32 %v582_v36, 0.0  ;;  %v585_v42 = vadd.f32 %v1730_v23, %v584_v40  ;;  %1421 = vmatprep.mubr.msk.bf16.mxu1 %vm747_vm1, %v714_v35 }
 0x119   : > { %v663_v43 = vmax.f32 %v593_v39, 0.0  ;;  %1422 = vmatmul.mubr.msk.bf16.gmra.mrb[12].mxu1 %vm747_vm1, %v715_v32  ;;  %v694_v45 = vmin.f32 %v662_v38, 1.0 }
 0x11a   : > { %v661_v44 = vmax.f32 %v585_v42, 0.0  ;;  %v692_v47 = vmin.f32 %v660_v41, 1.0  ;;  %v1783_v42 = vld [vmem:[%s1966_s5] sm:$0x1] }
 0x11b   : > { %v695_v46 = vmin.f32 %v663_v43, 1.0  ;;  %v1577_v43 = vmov 0  }
 0x11c   : > { %v693_v48 = vmin.f32 %v661_v44, 1.0  ;;  %v1395_v49 = vpop.f32.mrb[20].mxu0  ;;  %1490 = vset.pattern.permute.xlu0 %v1577_v43  ;;  %v1790_v44 = vld [vmem:[%s1965_s4] ss:$0 sm:$0xff] }
 0x11d   : > { %v717_v50 = vpack.c.bf16 %v695_v46, %v694_v45  ;;  %v606_v51 = vadd.f32 %v1395_v49, %v1730_v23  ;;  %v597_v52 = vpop.f32.mrb[21].mxu0 }
 0x11e   : > { %v716_v53 = vpack.c.bf16 %v693_v48, %v692_v47  ;;  %v598_v54 = vadd.f32 %v1730_v23, %v597_v52  ;;  %v1396_v55 = vpop.f32.mrb[22].mxu0 }
 0x11f   : > { %v666_v56 = vmax.f32 %v606_v51, 0.0  ;;  %v609_v57 = vadd.f32 %v1396_v55, %v1730_v23  ;;  %v600_v58 = vpop.f32.mrb[23].mxu0 }
 0x120   : > { %v664_v59 = vmax.f32 %v598_v54, 0.0  ;;  %v601_v60 = vadd.f32 %v1730_v23, %v600_v58  ;;  %1425 = vmatprep.mubr.msk.bf16.mxu1 %vm747_vm1, %v716_v53 }
 0x121   : > { %v698_v61 = vmin.f32 %v666_v56, 1.0  ;;  %v667_v62 = vmax.f32 %v609_v57, 0.0  ;;  %1426 = vmatmul.mubr.msk.bf16.gmra.mrb[16].mxu1 %vm747_vm1, %v717_v50 }
 0x122   : > { %v696_v63 = vmin.f32 %v664_v59, 1.0  ;;  %v665_v0 = vmax.f32 %v601_v60, 0.0 }
 0x123   : > { %v699_v1 = vmin.f32 %v667_v62, 1.0 }
 0x124   : > { %v697_v2 = vmin.f32 %v665_v0, 1.0  ;;  %v1399_v3 = vpop.f32.mrb[24].mxu0 }
 0x125   : > { %v719_v4 = vpack.c.bf16 %v699_v1, %v698_v61  ;;  %v622_v5 = vadd.f32 %v1399_v3, %v1730_v23  ;;  %v613_v6 = vpop.f32.mrb[25].mxu0 }
 0x126   : > { %v718_v7 = vpack.c.bf16 %v697_v2, %v696_v63  ;;  %v614_v8 = vadd.f32 %v1730_v23, %v613_v6  ;;  %v1400_v9 = vpop.f32.mrb[26].mxu0 }
 0x127   : > { %v670_v10 = vmax.f32 %v622_v5, 0.0  ;;  %v625_v11 = vadd.f32 %v1400_v9, %v1730_v23  ;;  %v616_v12 = vpop.f32.mrb[27].mxu0 }
 0x128   : > { %1429 = vmatprep.mubr.msk.bf16.mxu1 %vm747_vm1, %v718_v7  ;;  %v668_v13 = vmax.f32 %v614_v8, 0.0  ;;  %v617_v14 = vadd.f32 %v1730_v23, %v616_v12 }
 0x129   : > { %1430 = vmatmul.mubr.msk.bf16.gmra.mrb[20].mxu1 %vm747_vm1, %v719_v4  ;;  %v702_v15 = vmin.f32 %v670_v10, 1.0  ;;  %v671_v16 = vmax.f32 %v625_v11, 0.0 }
 0x12a   : > { %v700_v17 = vmin.f32 %v668_v13, 1.0  ;;  %v669_v18 = vmax.f32 %v617_v14, 0.0 }
 0x12b   : > { %v703_v19 = vmin.f32 %v671_v16, 1.0 }
 0x12c   : > { %v701_v20 = vmin.f32 %v669_v18, 1.0  ;;  %v1403_v21 = vpop.f32.mrb[28].mxu0 }
 0x12d   : > { %v721_v22 = vpack.c.bf16 %v703_v19, %v702_v15  ;;  %v638_v24 = vadd.f32 %v1403_v21, %v1730_v23  ;;  %v629_v25 = vpop.f32.mrb[29].mxu0 }
 0x12e   : > { %v720_v26 = vpack.c.bf16 %v701_v20, %v700_v17  ;;  %v630_v27 = vadd.f32 %v1730_v23, %v629_v25  ;;  %v1404_v28 = vpop.f32.mrb[30].mxu0 }
 0x12f   : > { %v674_v29 = vmax.f32 %v638_v24, 0.0  ;;  %v641_v30 = vadd.f32 %v1404_v28, %v1730_v23  ;;  %v632_v31 = vpop.f32.mrb[31].mxu0 }
 0x130   : > { %1433 = vmatprep.mubr.msk.bf16.mxu1 %vm747_vm1, %v720_v26  ;;  %v672_v32 = vmax.f32 %v630_v27, 0.0  ;;  %v633_v33 = vadd.f32 %v1730_v23, %v632_v31  ;;  %v1038_v23 = vld [vmem:[#allocation2] sm:$0x1] }
 0x131   : > { %1434 = vmatmul.mubr.msk.bf16.gmra.mrb[24].mxu1 %vm747_vm1, %v721_v22  ;;  %v706_v34 = vmin.f32 %v674_v29, 1.0  ;;  %v675_v35 = vmax.f32 %v641_v30, 0.0  ;;  %1041 = vperm.xlu0 %1490, %v1038_v23  }
 0x132   : > { %v704_v36 = vmin.f32 %v672_v32, 1.0  ;;  %v673_v37 = vmax.f32 %v633_v33, 0.0 }
 0x133   : > { %v707_v38 = vmin.f32 %v675_v35, 1.0 }
 0x134   : > { %v705_v39 = vmin.f32 %v673_v37, 1.0 }
 0x135   : > { %v723_v40 = vpack.c.bf16 %v707_v38, %v706_v34 }
 0x136   : > { %v722_v41 = vpack.c.bf16 %v705_v39, %v704_v36 }
 0x138   : > { %1437 = vmatprep.mubr.msk.bf16.mxu1 %vm747_vm1, %v722_v41 }
 0x139   : > { %1438 = vmatmul.mubr.msk.bf16.gmra.mrb[28].mxu1 %vm747_vm1, %v723_v40 }
 0x13a   : > { %1363 = vmatprep.mubr.msk.bf16.mxu1 %vm747_vm1, %v1783_v42 }
 0x1d4   : > { %v1411_v45 = vpop.f32.mrb[0].mxu1 }
 0x1d5   : > { %v839_v46 = vadd.f32 %v1411_v45, %v1790_v44  ;;  %v830_v47 = vpop.f32.mrb[1].mxu1 }
 0x1d6   : > { %v831_v48 = vadd.f32 %v1790_v44, %v830_v47  ;;  %v1412_v49 = vpop.f32.mrb[2].mxu1 }
 0x1d7   : > { %v959_v50 = vmax.f32 %v839_v46, 0.0  ;;  %v842_v51 = vadd.f32 %v1412_v49, %v1790_v44  ;;  %v833_v52 = vpop.f32.mrb[3].mxu1 }
 0x1d8   : > { %v957_v53 = vmax.f32 %v831_v48, 0.0  ;;  %v834_v54 = vadd.f32 %v1790_v44, %v833_v52 }
 0x1d9   : > { %v960_v55 = vmax.f32 %v842_v51, 0.0  ;;  %v1796_v57 = vmin.f32 %v959_v50, 1.0 }
 0x1da   : > { %v958_v56 = vmax.f32 %v834_v54, 0.0  ;;  %v1800_v59 = vmin.f32 %v957_v53, 1.0 }
 0x1db   : > { %v1798_v58 = vmin.f32 %v960_v55, 1.0 }
 0x1dc   : > { %v1802_v60 = vmin.f32 %v958_v56, 1.0  ;;  %v1415_v61 = vpop.f32.mrb[4].mxu1 }
 0x1dd   : > { %v1023_v62 = vpack.c.bf16 %v1798_v58, %v1796_v57  ;;  %v855_v63 = vadd.f32 %v1415_v61, %v1790_v44  ;;  %v846_v0 = vpop.f32.mrb[5].mxu1 }
 0x1de   : > { %v1022_v1 = vpack.c.bf16 %v1802_v60, %v1800_v59  ;;  %v847_v2 = vadd.f32 %v1790_v44, %v846_v0  ;;  %v1416_v3 = vpop.f32.mrb[6].mxu1 }
 0x1df   : > { %v963_v4 = vmax.f32 %v855_v63, 0.0  ;;  %v858_v5 = vadd.f32 %v1416_v3, %v1790_v44  ;;  %v849_v6 = vpop.f32.mrb[7].mxu1 }
 0x1e0   : > { %v961_v7 = vmax.f32 %v847_v2, 0.0  ;;  %v850_v8 = vadd.f32 %v1790_v44, %v849_v6 }
 0x1e1   : > { %v964_v9 = vmax.f32 %v858_v5, 0.0  ;;  %v1812_v11 = vmin.f32 %v963_v4, 1.0 }
 0x1e2   : > { %v962_v10 = vmax.f32 %v850_v8, 0.0  ;;  %v1816_v13 = vmin.f32 %v961_v7, 1.0 }
 0x1e3   : > { %v1814_v12 = vmin.f32 %v964_v9, 1.0 }
 0x1e4   : > { %v1818_v14 = vmin.f32 %v962_v10, 1.0  ;;  %v1419_v15 = vpop.f32.mrb[8].mxu1 }
 0x1e5   : > { %v1025_v16 = vpack.c.bf16 %v1814_v12, %v1812_v11  ;;  %v871_v17 = vadd.f32 %v1419_v15, %v1790_v44  ;;  %v862_v18 = vpop.f32.mrb[9].mxu1 }
 0x1e6   : > { %v1024_v19 = vpack.c.bf16 %v1818_v14, %v1816_v13  ;;  %v863_v20 = vadd.f32 %v1790_v44, %v862_v18  ;;  %v1420_v21 = vpop.f32.mrb[10].mxu1 }
 0x1e7   : > { %v967_v22 = vmax.f32 %v871_v17, 0.0  ;;  %v874_v24 = vadd.f32 %v1420_v21, %v1790_v44  ;;  %v865_v25 = vpop.f32.mrb[11].mxu1  ;;  %v1061_v13 = vsel %vm747_vm1, %v1025_v16, 0  ;;  %v1044_v16 = vlaneseq }
 0x1e8   : > { %v965_v26 = vmax.f32 %v863_v20, 0.0  ;;  %v866_v27 = vadd.f32 %v1790_v44, %v865_v25 }
 0x1e9   : > { %v968_v28 = vmax.f32 %v874_v24, 0.0  ;;  %v1828_v30 = vmin.f32 %v967_v22, 1.0  ;;  %vm1162_vm2 = vcmp.lt.s32.totalorder %v1044_v16, 256 }
 0x1ea   : > { %v966_v29 = vmax.f32 %v866_v27, 0.0  ;;  %v1832_v32 = vmin.f32 %v965_v26, 1.0 }
 0x1eb   : > { %v1830_v31 = vmin.f32 %v968_v28, 1.0 }
 0x1ec   : > { %v1834_v33 = vmin.f32 %v966_v29, 1.0  ;;  %v1423_v34 = vpop.f32.mrb[12].mxu1 }
 0x1ed   : > { %v1027_v35 = vpack.c.bf16 %v1830_v31, %v1828_v30  ;;  %v887_v36 = vadd.f32 %v1423_v34, %v1790_v44  ;;  %v878_v37 = vpop.f32.mrb[13].mxu1  ;;  %v1042_v31 = vpop.permute.xlu0 %1041 }
 0x1ee   : > { %v1026_v38 = vpack.c.bf16 %v1834_v33, %v1832_v32  ;;  %v879_v39 = vadd.f32 %v1790_v44, %v878_v37  ;;  %v1424_v40 = vpop.f32.mrb[14].mxu1  ;;  %v1052_v37 = vsel %vm747_vm1, %v1022_v1, 0  ;;  %v1578_v32 = vmov 1966171168  }
 0x1ef   : > { %v971_v41 = vmax.f32 %v887_v36, 0.0  ;;  %v890_v23 = vadd.f32 %v1424_v40, %v1790_v44  ;;  %v881_v43 = vpop.f32.mrb[15].mxu1  ;;  %v1067_v14 = vsel %vm747_vm1, %v1027_v35, 0  ;;  %v1146_v33 = vunpack.c.l.s4 %v1578_v32 }
 0x1f0   : > { %v969_v45 = vmax.f32 %v879_v39, 0.0  ;;  %v882_v46 = vadd.f32 %v1790_v44, %v881_v43 }
 0x1f1   : > { %v972_v47 = vmax.f32 %v890_v23, 0.0  ;;  %v1844_v49 = vmin.f32 %v971_v41, 1.0 }
 0x1f2   : > { %v970_v48 = vmax.f32 %v882_v46, 0.0  ;;  %v1848_v51 = vmin.f32 %v969_v45, 1.0 }
 0x1f3   : > { %v1846_v50 = vmin.f32 %v972_v47, 1.0 }
 0x1f4   : > { %v1850_v52 = vmin.f32 %v970_v48, 1.0  ;;  %v1427_v53 = vpop.f32.mrb[16].mxu1 }
 0x1f5   : > { %v1029_v54 = vpack.c.bf16 %v1846_v50, %v1844_v49  ;;  %v903_v55 = vadd.f32 %v1427_v53, %v1790_v44  ;;  %v894_v56 = vpop.f32.mrb[17].mxu1 }
 0x1f6   : > { %v1028_v61 = vpack.c.bf16 %v1850_v52, %v1848_v51  ;;  %v895_v63 = vadd.f32 %v1790_v44, %v894_v56  ;;  %v1428_v0 = vpop.f32.mrb[18].mxu1 }
 0x1f7   : > { %v975_v2 = vmax.f32 %v903_v55, 0.0  ;;  %v906_v3 = vadd.f32 %v1428_v0, %v1790_v44  ;;  %v897_v4 = vpop.f32.mrb[19].mxu1  ;;  %v1055_v0 = vsel %vm747_vm1, %v1023_v62, 0  ;;  %v1073_v12 = vsel %vm747_vm1, %v1029_v54, 0 }
 0x1f8   : > { %v973_v5 = vmax.f32 %v895_v63, 0.0  ;;  %v898_v6 = vadd.f32 %v1790_v44, %v897_v4  ;;  %v1070_v11 = vsel %vm747_vm1, %v1028_v61, 0 }
 0x1f9   : > { %v976_v7 = vmax.f32 %v906_v3, 0.0  ;;  %v1007_v9 = vmin.f32 %v975_v2, 1.0 }
 0x1fa   : > { %v974_v8 = vmax.f32 %v898_v6, 0.0  ;;  %v1005_v15 = vmin.f32 %v973_v5, 1.0 }
 0x1fb   : > { %v1008_v10 = vmin.f32 %v976_v7, 1.0 }
 0x1fc   : > { %v1006_v17 = vmin.f32 %v974_v8, 1.0  ;;  %v1431_v18 = vpop.f32.mrb[20].mxu1 }
 0x1fd   : > { %v1031_v20 = vpack.c.bf16 %v1008_v10, %v1007_v9  ;;  %v919_v21 = vadd.f32 %v1431_v18, %v1790_v44  ;;  %v910_v22 = vpop.f32.mrb[21].mxu1 }
 0x1fe   : > { %v1030_v24 = vpack.c.bf16 %v1006_v17, %v1005_v15  ;;  %v911_v25 = vadd.f32 %v1790_v44, %v910_v22  ;;  %v1432_v26 = vpop.f32.mrb[22].mxu1 }
 0x1ff   : > { %v979_v27 = vmax.f32 %v919_v21, 0.0  ;;  %v922_v28 = vadd.f32 %v1432_v26, %v1790_v44  ;;  %v913_v29 = vpop.f32.mrb[23].mxu1 }
 0x200   : > { %v977_v34 = vmax.f32 %v911_v25, 0.0  ;;  %v914_v36 = vadd.f32 %v1790_v44, %v913_v29  ;;  %1441 = vmatprep.subr.msk.bf16.mxu1 %vm747_vm1, %v1030_v24  ;;  %v1058_v24 = vsel %vm747_vm1, %v1024_v19, 0  ;;  %v1045_v19 = vshrl.u32 %v1044_v16, 7 }
 0x201   : > { %v1011_v39 = vmin.f32 %v979_v27, 1.0  ;;  %v980_v40 = vmax.f32 %v922_v28, 0.0  ;;  %1348 = vmatpush3.bf16.xpose.msra.mxu1 %v1052_v37 }
 0x202   : > { %v1009_v41 = vmin.f32 %v977_v34, 1.0  ;;  %v978_v23 = vmax.f32 %v914_v36, 0.0  ;;  %1442 = vmatprep.subr.msk.bf16.mxu1 %vm747_vm1, %v1031_v20  ;;  %v1046_v30 = vsub.s32 0, %v1045_v19 }
 0x203   : > { %v1012_v43 = vmin.f32 %v980_v40, 1.0 }
 0x204   : > { %v1010_v45 = vmin.f32 %v978_v23, 1.0  ;;  %v1435_v46 = vpop.f32.mrb[24].mxu1  ;;  %v1047_v35 = vrot.slane %v1042_v31, %v1046_v30 }
 0x205   : > { %v1033_v47 = vpack.c.bf16 %v1012_v43, %v1011_v39  ;;  %v935_v48 = vadd.f32 %v1435_v46, %v1790_v44  ;;  %v926_v53 = vpop.f32.mrb[25].mxu1 }
 0x206   : > { %v1032_v55 = vpack.c.bf16 %v1010_v45, %v1009_v41  ;;  %v927_v56 = vadd.f32 %v1790_v44, %v926_v53  ;;  %v1436_v59 = vpop.f32.mrb[26].mxu1 }
 0x207   : > { %v983_v60 = vmax.f32 %v935_v48, 0.0  ;;  %v938_v1 = vadd.f32 %v1436_v59, %v1790_v44  ;;  %v929_v63 = vpop.f32.mrb[27].mxu1 }
 0x208   : > { %v981_v2 = vmax.f32 %v927_v56, 0.0  ;;  %v930_v3 = vadd.f32 %v1790_v44, %v929_v63 }
 0x209   : > { %1350 = vmatpush3.bf16.xpose.msra.mxu1 %v1055_v0  ;;  %v1015_v4 = vmin.f32 %v983_v60, 1.0  ;;  %v984_v5 = vmax.f32 %v938_v1, 0.0 }
 0x20a   : > { %1443 = vmatprep.subr.msk.bf16.mxu1 %vm747_vm1, %v1032_v55  ;;  %v1013_v6 = vmin.f32 %v981_v2, 1.0  ;;  %v982_v7 = vmax.f32 %v930_v3, 0.0 }
 0x20b   : > { %v1016_v8 = vmin.f32 %v984_v5, 1.0 }
 0x20c   : > { %v1014_v9 = vmin.f32 %v982_v7, 1.0  ;;  %v1439_v10 = vpop.f32.mrb[28].mxu1 }
 0x20d   : > { %v1035_v15 = vpack.c.bf16 %v1016_v8, %v1015_v4  ;;  %v951_v17 = vadd.f32 %v1439_v10, %v1790_v44  ;;  %v942_v18 = vpop.f32.mrb[29].mxu1 }
 0x20e   : > { %v1034_v57 = vpack.c.bf16 %v1014_v9, %v1013_v6  ;;  %v943_v58 = vadd.f32 %v1790_v44, %v942_v18  ;;  %v1440_v62 = vpop.f32.mrb[30].mxu1 }
 0x20f   : > { %v987_v20 = vmax.f32 %v951_v17, 0.0  ;;  %v954_v21 = vadd.f32 %v1440_v62, %v1790_v44  ;;  %v945_v22 = vpop.f32.mrb[31].mxu1 }
 0x210   : > { %v985_v25 = vmax.f32 %v943_v58, 0.0  ;;  %v946_v26 = vadd.f32 %v1790_v44, %v945_v22  ;;  %v1064_v44 = vsel %vm747_vm1, %v1026_v38, 0  ;;  %v1147_v38 = vunpack.c.0.s8 %v1146_v33 }
 0x211   : > { %1352 = vmatpush3.bf16.xpose.msra.mxu1 %v1058_v24  ;;  %v1019_v27 = vmin.f32 %v987_v20, 1.0  ;;  %v988_v28 = vmax.f32 %v954_v21, 0.0 }
 0x212   : > { %1444 = vmatprep.subr.msk.bf16.mxu1 %vm747_vm1, %v1033_v47  ;;  %v1017_v29 = vmin.f32 %v985_v25, 1.0  ;;  %v986_v34 = vmax.f32 %v946_v26, 0.0 }
 0x213   : > { %v1020_v36 = vmin.f32 %v988_v28, 1.0 }
 0x214   : > { %v1018_v37 = vmin.f32 %v986_v34, 1.0 }
 0x215   : > { %v1037_v39 = vpack.c.bf16 %v1020_v36, %v1019_v27 }
 0x216   : > { %v1036_v40 = vpack.c.bf16 %v1018_v37, %v1017_v29 }
 0x219   : > { %1354 = vmatpush3.bf16.xpose.msra.mxu1 %v1061_v13 }
 0x21a   : > { %1445 = vmatprep.subr.msk.bf16.mxu1 %vm747_vm1, %v1034_v57 }
 0x221   : > { %1356 = vmatpush3.bf16.xpose.msra.mxu1 %v1064_v44 }
 0x222   : > { %1446 = vmatprep.subr.msk.bf16.mxu1 %vm747_vm1, %v1035_v15 }
 0x229   : > { %1358 = vmatpush3.bf16.xpose.msra.mxu1 %v1067_v14 }
 0x22a   : > { %1447 = vmatprep.subr.msk.bf16.mxu1 %vm747_vm1, %v1036_v40 }
 0x231   : > { %1360 = vmatpush3.bf16.xpose.msra.mxu1 %v1070_v11 }
 0x232   : > { %1448 = vmatprep.subr.msk.bf16.mxu1 %vm747_vm1, %v1037_v39 }
 0x239   : > { %1362 = vmatpush3.bf16.xpose.msra.mxu1 %v1073_v12 }
 0x240   : > { %1364 = vmatmul.mubr.msk.bf16.vlgmr.msra.gmra.mrb[32].mxu1 %vm747_vm1, %v1783_v42  ;;  %v1150_v42 = vsub.s32 %v1147_v38, %v1045_v19 }
 0x313   : > { %v1133_v51 = vpop.f32.mrb[32].mxu1 }
 0x314   : > { %v1134_v52 = vadd.f32 %v1133_v51, %v1047_v35  ;;  %v1135_v61 = vpop.f32.mrb[33].mxu1 }
 0x315   : > { %v1136_v49 = vadd.f32 %v1135_v61, %v1047_v35  ;;  %v1137_v50 = vpop.f32.mrb[34].mxu1 }
 0x316   : > { %v1140_v54 = vmul.f32 512.0, %v1134_v52  ;;  %v1138_v41 = vpop.f32.mrb[35].mxu1 }
 0x317   : > { %v1141_v23 = vmul.f32 512.0, %v1136_v49 }
 0x319   : > { %v1144_v43 = vcombine.low %v1140_v54, %v1141_v23 }
 0x31b   : > { %v1151_v45 = vrot.slane %v1144_v43, %v1150_v42 }
 0x31d   : > { %v1158_v46 = vrot.slane %v1151_v45, %v1150_v42 }
 0x31f   : > { %1164 = vst.msk [vmem:[%s274_s25] sm:$0x3] %vm1162_vm2, %v1158_v46 }
 0x320   : > { %1526 = shalt.err (!%p1523_p3)
}
 0x321   : > { %s1527_s16 = scalar_lea.hbm %s1919_s10, 32  ;;  %s1531_s22 = scalar_lea.hbm %s1968_s7, 64 }
 0x322   : > { %p1528_p4 = scmp.ne.s32.totalorder %s1919_s10, %s1527_s16  ;;  %p1532_p9 = scmp.lt.u32.totalorder %s1919_s10, %s1968_s7 }
 0x323   : > { %p1533_p10 = scmp.lt.u32.totalorder %s1531_s22, %s1527_s16  ;;  %p1535_p12 = scmp.lt.u32.totalorder %s1527_s16, %s1919_s10 }
 0x324   : > { %p1529_p7 = pnand %p1528_p4, %p1658_p5 }
 0x325   : > { %p1534_p11 = por %p1533_p10, %p1532_p9 }
 0x326   : > { %p1530_p8 = pneg %p1529_p7 }
 0x327   : > { %p1536_p13 = por %p1535_p12, %p1534_p11 }
 0x329   : > { %p1537_p0 = pnand %p1536_p13, %p1530_p8 }
 0x32b   : > { %1540 = shalt.err (!%p1537_p0)
}
 0x32c   : > { %1449 = dma.vmem_to_hbm [thread:$0]  (%p1658_p5), %s1921_s6, 32, %s1919_s10, %s1166_s14  }
 0x32d PF: > { %p1455_p1 = scmp.ge.s32.totalorder %s1575_s29, 2  ;;  %s1192_s25 = sand.u32 1, %s1563_s26  }
 0x32e   : > { %s1193_s30 = scalar_lea.sflag [#allocation4], %s1192_s25 }
 0x32f   : > { %p1452_p2 = pnand %p1455_p1, %p1662_p6 }
 0x331   : > { %1558 = dma.done.wait (!%p1452_p2), %s1193_s30, 32  }
 0x332   : > { %1560 = vsyncadd (!%p1452_p2), %s1193_s30, 4294967264  ;;  %p19_p3 = scmp.ge.s32.totalorder %s1646_s8, 4   ;;  %s1971_s26 = smov %s1567_s27 }
 0x333   : > { %s1972_s27 = smov %s1571_s28  ;;  %s1973_s28 = smov %s1656_s11 }
 0x334   : > { %s1974_s29 = smov %s1646_s8  ;;  %21 = sbr.rel (!%p19_p3) target bundleno = 6 (0x6), region = 83 }
 0x33b   :  { %1198 = vsyncpa [#allocation4], 1 }
 0x33c   :  { %1200 = vsyncpa [#allocation4 + $0x1], 1 }

</bundles_post_ra>
